<compile_context>
chip_gen: v7x
topology: tpu7x:2x2x1
jax: 0.10.0
libtpu: 0.0.40
codegen_flags: <defaults>
</compile_context>

<pallas_src>
import functools

import jax
import jax.numpy as jnp
from jax.experimental import pallas as pl
from jax.experimental.pallas import tpu as pltpu


def _dice_kernel(pred_ref, target_ref, th_ref, t_ref, tht_ref, *,
                 tile_r, r_true, num_tiles, tiles_per_split, ragged, has_dup):
    """Grid = (core_split, sample, feature_tile).

    pred_ref / target_ref   : (1, tile_r, 128) input tiles
    th_ref / t_ref / tht_ref: (1, 1, 128) lane-dense per-(split, sample)
                              accumulators of sum(tanh(x/2)), sum(t),
                              sum(t*tanh(x/2)); resident across the innermost
                              (reduction) grid axis.
    """
    c = pl.program_id(0)
    j = pl.program_id(2)
    gt = c * tiles_per_split + j              # global feature-tile index

    # Reset accumulators at the start of this (split, sample) reduction.
    @pl.when(j == 0)
    def _():
        th_ref[...] = jnp.zeros_like(th_ref)
        t_ref[...] = jnp.zeros_like(t_ref)
        tht_ref[...] = jnp.zeros_like(tht_ref)

    def accumulate(mask_rows):
        x = pred_ref[...].astype(jnp.float32)
        th = jnp.tanh(0.5 * x)                # sigmoid(x) = 0.5*(th + 1); EUP push
        t = target_ref[...].astype(jnp.float32)
        if mask_rows:
            # Only ever traced for the ragged last tile: zero rows past r_true.
            row = (jax.lax.broadcasted_iota(jnp.int32, x.shape, 1)
                   + (num_tiles - 1) * tile_r)
            valid = row < r_true
            th = jnp.where(valid, th, 0.0)
            t = jnp.where(valid, t, 0.0)
        # Sublane-axis reduction only; lanes stay dense.
        th_ref[...] += jnp.sum(th, axis=1, keepdims=True)
        t_ref[...] += jnp.sum(t, axis=1, keepdims=True)
        tht_ref[...] += jnp.sum(th * t, axis=1, keepdims=True)

    if (not ragged) and (not has_dup):
        # Clean streaming path: no masking, no branches.
        accumulate(False)
    else:
        last = num_tiles - 1

        @pl.when(gt < last)
        def _():
            accumulate(False)                 # steady state stays unmasked

        @pl.when(gt == last)
        def _():
            accumulate(ragged)                # mask only the ragged last tile
        # gt > last can only happen for the duplicated tile introduced by the
        # core-split when num_tiles is odd; it is skipped entirely.


@functools.partial(jax.jit, static_argnames=("block_bytes",))
def criterion_dice(pred, target, *, block_bytes=4 * 1024 * 1024):
    """Dice loss. pred/target: (N, C, H, W), any floating dtype."""
    n = target.shape[0]
    pred_flat = pred.reshape(n, -1)
    target_flat = target.reshape(n, -1)
    d = pred_flat.shape[1]

    r = d // 128               # full lane-dense rows per sample
    d_main = r * 128           # elements handled by the kernel per sample

    inter = jnp.zeros((n,), jnp.float32)
    denom = jnp.zeros((n,), jnp.float32)

    if r > 0:
        if d_main != d:
            # TODO(synk): this prefix slice materializes one extra HBM copy;
            # it only triggers when C*H*W is not a multiple of 128.
            pred_main = pred_flat[:, :d_main]
            target_main = target_flat[:, :d_main]
        else:
            pred_main = pred_flat
            target_main = target_flat
        pred3 = pred_main.reshape(n, r, 128)       # contiguous when d_main == d
        target3 = target_main.reshape(n, r, 128)

        itemsize = max(jnp.dtype(pred.dtype).itemsize,
                       jnp.dtype(target.dtype).itemsize)
        min_itemsize = min(jnp.dtype(pred.dtype).itemsize,
                           jnp.dtype(target.dtype).itemsize)
        # Native sublane pack: 8 rows for f32, 16 for bf16, 32 for int8/fp8.
        pack = max(8, 32 // min_itemsize)

        # ~block_bytes per input buffer (4 MiB default -> 16 MiB total with
        # double buffering: near the HBM roofline and safe on v7x's VMEM).
        tile_r_max = max(pack, block_bytes // (128 * itemsize))
        if r <= tile_r_max:
            tile_r = r                      # full dim -> always a legal block
        else:
            tile_r = (tile_r_max // pack) * pack
        num_tiles = pl.cdiv(r, tile_r)
        ragged = num_tiles * tile_r != r

        # Split the reduction range in two so v7x's 2 TensorCores both work
        # even when N is 1 or odd; near-free on single-TC v5e/v6e.
        split = 2 if num_tiles >= 2 else 1
        tiles_per_split = pl.cdiv(num_tiles, split)
        has_dup = split * tiles_per_split != num_tiles

        if has_dup:
            # Clamp the (single) out-of-range duplicate tile; the kernel skips
            # its accumulation.
            in_map = lambda c, i, j: (
                i, jnp.minimum(c * tiles_per_split + j, num_tiles - 1), 0)
        else:
            in_map = lambda c, i, j: (i, c * tiles_per_split + j, 0)
        out_map = lambda c, i, j: (c * n + i, 0, 0)

        kernel = functools.partial(
            _dice_kernel, tile_r=tile_r, r_true=r, num_tiles=num_tiles,
            tiles_per_split=tiles_per_split, ragged=ragged, has_dup=has_dup)

        acc_shape = jax.ShapeDtypeStruct((split * n, 1, 128), jnp.float32)
        cost = pl.CostEstimate(
            flops=5 * n * d_main,
            transcendentals=n * d_main,
            bytes_accessed=2 * n * d_main * itemsize + 3 * split * n * 128 * 4)

        s_th, s_t, s_tht = pl.pallas_call(
            kernel,
            out_shape=(acc_shape, acc_shape, acc_shape),
            grid_spec=pltpu.PrefetchScalarGridSpec(
                num_scalar_prefetch=0,
                grid=(split, n, tiles_per_split),
                in_specs=[
                    pl.BlockSpec((1, tile_r, 128), in_map),
                    pl.BlockSpec((1, tile_r, 128), in_map),
                ],
                out_specs=[
                    pl.BlockSpec((1, 1, 128), out_map),
                    pl.BlockSpec((1, 1, 128), out_map),
                    pl.BlockSpec((1, 1, 128), out_map),
                ],
            ),
            compiler_params=pltpu.CompilerParams(
                dimension_semantics=("parallel", "parallel", "arbitrary"),
                vmem_limit_bytes=32 * 1024 * 1024,
            ),
            cost_estimate=cost,
        )(pred3, target3)

        # Tiny finalize: cross-lane/core-split reduce + hoisted sigmoid algebra.
        sum_th = jnp.sum(s_th.reshape(split, n, 128), axis=(0, 2))
        sum_t = jnp.sum(s_t.reshape(split, n, 128), axis=(0, 2))
        sum_tht = jnp.sum(s_tht.reshape(split, n, 128), axis=(0, 2))
        inter = 0.5 * (sum_tht + sum_t)                       # sum(p * t)
        denom = 0.5 * sum_th + 0.5 * jnp.float32(d_main) + sum_t  # sum(p)+sum(t)

    if d_main != d:
        # <128-element per-sample tail: negligible, plain jnp (no full-tensor pad).
        pt = jax.nn.sigmoid(pred_flat[:, d_main:].astype(jnp.float32))
        tt = target_flat[:, d_main:].astype(jnp.float32)
        inter = inter + jnp.sum(pt * tt, axis=1)
        denom = denom + jnp.sum(pt, axis=1) + jnp.sum(tt, axis=1)

    smooth = jnp.float32(1.0)
    dice = 2.0 * (inter + smooth) / (denom + smooth)
    return jnp.float32(1.0) - jnp.sum(dice) / jnp.float32(n)


def _reference_dice(pred, target):
    n = target.shape[0]
    smooth = 1.0
    p = jax.nn.sigmoid(pred.astype(jnp.float32)).reshape(n, -1)
    t = target.astype(jnp.float32).reshape(n, -1)
    inter = jnp.sum(p * t, axis=1)
    dice = 2.0 * (inter + smooth) / (jnp.sum(p, axis=1) + jnp.sum(t, axis=1) + smooth)
    return 1.0 - jnp.sum(dice) / n


if __name__ == "__main__":
    key = jax.random.PRNGKey(0)
    k_main, k_ragged, k_tail = jax.random.split(key, 3)

    def check(shape, subkey, *, block_bytes=4 * 1024 * 1024):
        k1, k2 = jax.random.split(subkey)
        pred = jax.random.normal(k1, shape, dtype=jnp.float32)
        target = (jax.random.uniform(k2, shape) > 0.5).astype(jnp.float32)
        loss = criterion_dice(pred, target, block_bytes=block_bytes)
        jax.block_until_ready(loss)
        ref = _reference_dice(pred, target)
        assert jnp.allclose(loss, ref, atol=1e-5, rtol=1e-5), (shape, loss, ref)
        return loss

    # Primary: small NCHW segmentation-style shape (single tile, clean path).
    check((2, 4, 16, 16), k_main)
    # Ragged last feature tile + reduction core-split + duplicate-tile skip.
    check((3, 5, 16, 32), k_ragged, block_bytes=4096)
    # Feature count not a multiple of 128 (kernel prefix + jnp tail path).
    check((2, 3, 7, 11), k_tail)

    print("KERNEL_OK")
</pallas_src>

<mosaic_0001>
module attributes {stable_mosaic.version = 11 : i64} {
  func.func @_dice_kernel(%arg0: i32, %arg1: i32, %arg2: i32, %arg3: memref<1x8x128xf32, #tpu.memory_space<vmem>>, %arg4: memref<1x8x128xf32, #tpu.memory_space<vmem>>, %arg5: memref<1x1x128xf32, #tpu.memory_space<vmem>>, %arg6: memref<1x1x128xf32, #tpu.memory_space<vmem>>, %arg7: memref<1x1x128xf32, #tpu.memory_space<vmem>>) attributes {dimension_semantics = [#tpu.dimension_semantics<parallel>, #tpu.dimension_semantics<parallel>, #tpu.dimension_semantics<arbitrary>], iteration_bounds = array<i64: 1, 2, 1>, scalar_prefetch = 0 : i64, scratch_operands = 0 : i64, tpu.core_type = #tpu.core_type<tc>, window_params = [{transform_indices = @transform_0, window_bounds = array<i64: 1, 8, 128>}, {transform_indices = @transform_1, window_bounds = array<i64: 1, 8, 128>}, {transform_indices = @transform_2, window_bounds = array<i64: 1, 1, 128>}, {transform_indices = @transform_3, window_bounds = array<i64: 1, 1, 128>}, {transform_indices = @transform_4, window_bounds = array<i64: 1, 1, 128>}]} {
    %c0_i32 = arith.constant 0 : i32
    %0 = arith.cmpi eq, %arg2, %c0_i32 : i32
    %1 = arith.extui %0 : i1 to i32
    %c0_i32_0 = arith.constant 0 : i32
    %2 = arith.cmpi ne, %1, %c0_i32_0 : i32
    scf.if %2 {
      %cst_27 = arith.constant 0.000000e+00 : f32
      %24 = vector.broadcast %cst_27 : f32 to vector<1x1x128xf32>
      %c0_28 = arith.constant 0 : index
      %c0_29 = arith.constant 0 : index
      %c0_30 = arith.constant 0 : index
      %25 = vector.load %arg5[%c0_28, %c0_29, %c0_30] : memref<1x1x128xf32, #tpu.memory_space<vmem>>, vector<1x1x128xf32>
      tpu.vector_store %arg5[%c0_28, %c0_29, %c0_30], %24 {strides = array<i32>} : memref<1x1x128xf32, #tpu.memory_space<vmem>>, vector<1x1x128xf32>,
      %cst_31 = arith.constant 0.000000e+00 : f32
      %26 = vector.broadcast %cst_31 : f32 to vector<1x1x128xf32>
      %c0_32 = arith.constant 0 : index
      %c0_33 = arith.constant 0 : index
      %c0_34 = arith.constant 0 : index
      %27 = vector.load %arg6[%c0_32, %c0_33, %c0_34] : memref<1x1x128xf32, #tpu.memory_space<vmem>>, vector<1x1x128xf32>
      tpu.vector_store %arg6[%c0_32, %c0_33, %c0_34], %26 {strides = array<i32>} : memref<1x1x128xf32, #tpu.memory_space<vmem>>, vector<1x1x128xf32>,
      %cst_35 = arith.constant 0.000000e+00 : f32
      %28 = vector.broadcast %cst_35 : f32 to vector<1x1x128xf32>
      %c0_36 = arith.constant 0 : index
      %c0_37 = arith.constant 0 : index
      %c0_38 = arith.constant 0 : index
      %29 = vector.load %arg7[%c0_36, %c0_37, %c0_38] : memref<1x1x128xf32, #tpu.memory_space<vmem>>, vector<1x1x128xf32>
      tpu.vector_store %arg7[%c0_36, %c0_37, %c0_38], %28 {strides = array<i32>} : memref<1x1x128xf32, #tpu.memory_space<vmem>>, vector<1x1x128xf32>,
    } else {
    }
    %c0 = arith.constant 0 : index
    %c0_1 = arith.constant 0 : index
    %c0_2 = arith.constant 0 : index
    %3 = vector.load %arg3[%c0, %c0_1, %c0_2] : memref<1x8x128xf32, #tpu.memory_space<vmem>>, vector<1x8x128xf32>
    %cst = arith.constant 5.000000e-01 : f32
    %4 = vector.broadcast %cst : f32 to vector<1x8x128xf32>
    %5 = arith.mulf %4, %3 : vector<1x8x128xf32>
    %6 = math.tanh %5 : vector<1x8x128xf32>
    %c0_3 = arith.constant 0 : index
    %c0_4 = arith.constant 0 : index
    %c0_5 = arith.constant 0 : index
    %7 = vector.load %arg4[%c0_3, %c0_4, %c0_5] : memref<1x8x128xf32, #tpu.memory_space<vmem>>, vector<1x8x128xf32>
    %c0_6 = arith.constant 0 : index
    %c0_7 = arith.constant 0 : index
    %c0_8 = arith.constant 0 : index
    %8 = vector.load %arg5[%c0_6, %c0_7, %c0_8] : memref<1x1x128xf32, #tpu.memory_space<vmem>>, vector<1x1x128xf32>
    %cst_9 = arith.constant dense<0.000000e+00> : vector<1x128xf32>
    %9 = vector.multi_reduction <add>, %6, %cst_9 [1] : vector<1x8x128xf32> to vector<1x128xf32>
    %10 = vector.shape_cast %9 : vector<1x128xf32> to vector<1x1x128xf32>
    %11 = arith.addf %8, %10 : vector<1x1x128xf32>
    %c0_10 = arith.constant 0 : index
    %c0_11 = arith.constant 0 : index
    %c0_12 = arith.constant 0 : index
    %12 = vector.load %arg5[%c0_10, %c0_11, %c0_12] : memref<1x1x128xf32, #tpu.memory_space<vmem>>, vector<1x1x128xf32>
    tpu.vector_store %arg5[%c0_10, %c0_11, %c0_12], %11 {strides = array<i32>} : memref<1x1x128xf32, #tpu.memory_space<vmem>>, vector<1x1x128xf32>,
    %c0_13 = arith.constant 0 : index
    %c0_14 = arith.constant 0 : index
    %c0_15 = arith.constant 0 : index
    %13 = vector.load %arg6[%c0_13, %c0_14, %c0_15] : memref<1x1x128xf32, #tpu.memory_space<vmem>>, vector<1x1x128xf32>
    %cst_16 = arith.constant dense<0.000000e+00> : vector<1x128xf32>
    %14 = vector.multi_reduction <add>, %7, %cst_16 [1] : vector<1x8x128xf32> to vector<1x128xf32>
    %15 = vector.shape_cast %14 : vector<1x128xf32> to vector<1x1x128xf32>
    %16 = arith.addf %13, %15 : vector<1x1x128xf32>
    %c0_17 = arith.constant 0 : index
    %c0_18 = arith.constant 0 : index
    %c0_19 = arith.constant 0 : index
    %17 = vector.load %arg6[%c0_17, %c0_18, %c0_19] : memref<1x1x128xf32, #tpu.memory_space<vmem>>, vector<1x1x128xf32>
    tpu.vector_store %arg6[%c0_17, %c0_18, %c0_19], %16 {strides = array<i32>} : memref<1x1x128xf32, #tpu.memory_space<vmem>>, vector<1x1x128xf32>,
    %c0_20 = arith.constant 0 : index
    %c0_21 = arith.constant 0 : index
    %c0_22 = arith.constant 0 : index
    %18 = vector.load %arg7[%c0_20, %c0_21, %c0_22] : memref<1x1x128xf32, #tpu.memory_space<vmem>>, vector<1x1x128xf32>
    %19 = arith.mulf %6, %7 : vector<1x8x128xf32>
    %cst_23 = arith.constant dense<0.000000e+00> : vector<1x128xf32>
    %20 = vector.multi_reduction <add>, %19, %cst_23 [1] : vector<1x8x128xf32> to vector<1x128xf32>
    %21 = vector.shape_cast %20 : vector<1x128xf32> to vector<1x1x128xf32>
    %22 = arith.addf %18, %21 : vector<1x1x128xf32>
    %c0_24 = arith.constant 0 : index
    %c0_25 = arith.constant 0 : index
    %c0_26 = arith.constant 0 : index
    %23 = vector.load %arg7[%c0_24, %c0_25, %c0_26] : memref<1x1x128xf32, #tpu.memory_space<vmem>>, vector<1x1x128xf32>
    tpu.vector_store %arg7[%c0_24, %c0_25, %c0_26], %22 {strides = array<i32>} : memref<1x1x128xf32, #tpu.memory_space<vmem>>, vector<1x1x128xf32>,
    return
  }
  func.func @transform_0(%arg0: i32, %arg1: i32, %arg2: i32) -> (i32, i32, i32) {
    %c1_i32 = arith.constant 1 : i32
    %0 = arith.muli %arg0, %c1_i32 : i32
    %1 = arith.addi %0, %arg2 : i32
    %c0_i32 = arith.constant 0 : i32
    %c0_i32_0 = arith.constant 0 : i32
    return %arg1, %1, %c0_i32 : i32, i32, i32
  }
  func.func @transform_1(%arg0: i32, %arg1: i32, %arg2: i32) -> (i32, i32, i32) {
    %c1_i32 = arith.constant 1 : i32
    %0 = arith.muli %arg0, %c1_i32 : i32
    %1 = arith.addi %0, %arg2 : i32
    %c0_i32 = arith.constant 0 : i32
    %c0_i32_0 = arith.constant 0 : i32
    return %arg1, %1, %c0_i32 : i32, i32, i32
  }
  func.func @transform_2(%arg0: i32, %arg1: i32, %arg2: i32) -> (i32, i32, i32) {
    %c2_i32 = arith.constant 2 : i32
    %0 = arith.muli %arg0, %c2_i32 : i32
    %1 = arith.addi %0, %arg1 : i32
    %c0_i32 = arith.constant 0 : i32
    %c0_i32_0 = arith.constant 0 : i32
    %c0_i32_1 = arith.constant 0 : i32
    return %1, %c0_i32, %c0_i32_0 : i32, i32, i32
  }
  func.func @transform_3(%arg0: i32, %arg1: i32, %arg2: i32) -> (i32, i32, i32) {
    %c2_i32 = arith.constant 2 : i32
    %0 = arith.muli %arg0, %c2_i32 : i32
    %1 = arith.addi %0, %arg1 : i32
    %c0_i32 = arith.constant 0 : i32
    %c0_i32_0 = arith.constant 0 : i32
    %c0_i32_1 = arith.constant 0 : i32
    return %1, %c0_i32, %c0_i32_0 : i32, i32, i32
  }
  func.func @transform_4(%arg0: i32, %arg1: i32, %arg2: i32) -> (i32, i32, i32) {
    %c2_i32 = arith.constant 2 : i32
    %0 = arith.muli %arg0, %c2_i32 : i32
    %1 = arith.addi %0, %arg1 : i32
    %c0_i32 = arith.constant 0 : i32
    %c0_i32_0 = arith.constant 0 : i32
    %c0_i32_1 = arith.constant 0 : i32
    return %1, %c0_i32, %c0_i32_0 : i32, i32, i32
  }
}

</mosaic_0001>

<bundles_post_ra>
// kernel: criterion_dice.1
= control target key start
LH: loop header
LB: loop body
LE: loop exit
PB: predicated region body
PF: predicated region fallthrough
CT: control target
= control target key end

     0   :  { %s580_s15 = smov 0   ;;  %s582_s16 = smov 0   ;;  %s632_s0 = inlined_call_operand.vmem [shape: f32[2,8,128], index: 0, kind: input, shape index: {}]   ;;  %s633_s1 = inlined_call_operand.vmem [shape: f32[2,8,128], index: 1, kind: input, shape index: {}]   ;;  %s634_s2 = inlined_call_operand.vmem [shape: f32[2,1,128], index: 2, kind: output, shape index: {0}]   ;;  %s635_s3 = inlined_call_operand.vmem [shape: f32[2,1,128], index: 3, kind: output, shape index: {1}]   ;;  %s636_s4 = inlined_call_operand.vmem [shape: f32[2,1,128], index: 4, kind: output, shape index: {2}]  }
   0x1   :  { %s584_s17 = smov 0  }
   0x2 LB: > { %s30_s18 = sadd.s32 1, %s548_s16  ;;  %p498_p0 = scmp.ge.s32.totalorder %s552_s17, 1  ;;  %s552_s17 = sphi %s584_s17, %s15_s17   ;;  %s548_s16 = sphi %s582_s16, %s638_s16   ;;  %s544_s15 = sphi %s580_s15, %s637_s15  }
   0x3   : > { %p32_p1 = scmp.ge.s32.totalorder %s30_s18, 2  ;;  %p224_p2 = scmp.lt.s32.totalorder %s552_s17, 3 }
   0x5   : > { %s640_s18 = smov (%p32_p1, %s30_s18), 0  ;;  %p225_p3 = pnand %p498_p0, %p224_p2 }
   0x6   : > { %p272_p4 = scmp.lt.s32.totalorder (!%p225_p3), %s544_s15, 1  ;;  %v554_v0 = vmov (!%p225_p3), 0.0  }
   0x7   : > { %228 = sbr.rel (%p225_p3) target bundleno = 48 (0x30), region = 28 }
   0xe   : > { %s642_s15 = smov (!%p272_p4, %s544_s15), 1 }
   0xf   : > { %s499_s19 = sshll.u32 %s642_s15, 3  ;;  %s601_s22 = scalar_lea.vmem %s634_s2, %s642_s15 }
  0x10   : > { %s278_s25 = scalar_lea.vmem %s632_s0, %s499_s19  ;;  %314 = vst [vmem:[%s601_s22] sm:$0x1] %v554_v0  ;;  %s300_s28 = scalar_lea.vmem %s635_s3, %s642_s15 }
  0x11   : > { %v317_v1 = vld [vmem:[%s278_s25] sm:$0xff]  ;;  %315 = vst [vmem:[%s300_s28] sm:$0x1] %v554_v0  ;;  %s613_s5 = scalar_lea.vmem %s636_s4, %s642_s15  ;;  %s287_s8 = scalar_lea.vmem %s633_s1, %s499_s19 }
  0x12   : > { %v318_v2 = vmul.f32 0.5, %v317_v1  ;;  %316 = vst [vmem:[%s613_s5] sm:$0x1] %v554_v0  ;;  %v320_v3 = vld [vmem:[%s287_s8] sm:$0xff] }
  0x13   : > { %v331_v4 = vrot.slane %v320_v3, 4 }
  0x14   : > { %528 = vtanh.f32 %v318_v2 }
  0x15   : > { %v332_v5 = vadd.f32 %v331_v4, %v320_v3 }
  0x17   : > { %v333_v6 = vrot.slane %v332_v5, 2  ;;  %v321_v23 = vld [vmem:[%s601_s22] sm:$0x1] }
  0x18   : > { %v330_v9 = vld [vmem:[%s300_s28] sm:$0x1] }
  0x19   : > { %v334_v7 = vadd.f32 %v333_v6, %v332_v5  ;;  %v339_v26 = vld [vmem:[%s613_s5] sm:$0x1] }
  0x1b   : > { %v335_v8 = vrot.slane %v334_v7, 1 }
  0x1d   : > { %v336_v10 = vadd.f32 %v335_v8, %v334_v7 }
  0x1e   : > { %v529_v11 = vpop.eup %528 }
  0x1f   : > { %v322_v12 = vrot.slane %v529_v11, 4  ;;  %v337_v13 = vadd.f32 %v336_v10, %v330_v9  ;;  %v340_v14 = vmul.f32 %v529_v11, %v320_v3 }
  0x21   : > { %v323_v15 = vadd.f32 %v529_v11, %v322_v12  ;;  %338 = vst [vmem:[%s300_s28] sm:$0x1] %v337_v13  ;;  %v341_v16 = vrot.slane %v340_v14, 4 }
  0x23   : > { %v324_v17 = vrot.slane %v323_v15, 2  ;;  %v342_v18 = vadd.f32 %v341_v16, %v340_v14 }
  0x25   : > { %v325_v19 = vadd.f32 %v324_v17, %v323_v15  ;;  %v343_v20 = vrot.slane %v342_v18, 2 }
  0x27   : > { %v326_v21 = vrot.slane %v325_v19, 1  ;;  %v344_v22 = vadd.f32 %v343_v20, %v342_v18 }
  0x29   : > { %v327_v24 = vadd.f32 %v326_v21, %v325_v19  ;;  %v345_v25 = vrot.slane %v344_v22, 1 }
  0x2b   : > { %v328_v27 = vadd.f32 %v327_v24, %v321_v23  ;;  %v346_v28 = vadd.f32 %v345_v25, %v344_v22 }
  0x2d   : > { %329 = vst [vmem:[%s601_s22] sm:$0x1] %v328_v27  ;;  %v347_v29 = vadd.f32 %v346_v28, %v339_v26 }
  0x2f   : > { %348 = vst [vmem:[%s613_s5] sm:$0x1] %v347_v29 }
  0x30 PF: > { %s15_s17 = sadd.s32 1, %s552_s17   ;;  %s637_s15 = smov %s548_s16 }
  0x31   : > { %p12_p5 = scmp.ge.s32.totalorder %s15_s17, 4   ;;  %s638_s16 = smov %s640_s18 }
  0x33   :  { %14 = sbr.rel (!%p12_p5) target bundleno = 2 (0x2), region = 89 }

</bundles_post_ra>
